<compile_context>
chip_gen: v7x
topology: tpu7x:2x2x1
jax: 0.10.0
libtpu: 0.0.40
codegen_flags: <defaults>
</compile_context>

<pallas_src>
import functools
from math import sqrt

import jax
import jax.numpy as jnp
from jax.experimental import pallas as pl
from jax.experimental.pallas import tpu as pltpu


def _round_up(x, m):
    return ((x + m - 1) // m) * m


def _style_mlp_kernel(x_ref, w_ref, b_ref, o_ref):
    """One batch-tile of the style MLP; all layers unrolled in-kernel.

    x_ref: (TB, Dp) f32          input codes for this batch tile
    w_ref: (n_mlp, Dp, Dp) bf16  VMEM-resident weight stack, (in, out) layout
    b_ref: (n_mlp, 1, Dp) bf16   VMEM-resident bias stack
    o_ref: (TB, Dp) f32          output styles for this batch tile
    """
    n_mlp = w_ref.shape[0]
    h = x_ref[...].astype(jnp.bfloat16)   # carry activation in bf16 (bit-exact vs f32 carry)
    y = None
    for l in range(n_mlp):                # static, fully unrolled in-kernel layer loop
        # bf16 MXU matmul with f32 accumulation.
        y = jnp.dot(h, w_ref[l], preferred_element_type=jnp.float32)
        y = y + b_ref[l].astype(jnp.float32)
        # EqualLinear's LeakyReLU(0.01) composed with the outer LeakyReLU(0.2):
        # sign-preserving, so exactly slope 0.01*0.2 = 0.002 on the negative branch.
        y = jnp.where(y >= 0.0, y, 0.002 * y)
        # Dropout is identity at inference.
        # TODO(synk): train-mode dropout via pltpu.prng_seed / pltpu.prng_random_bits.
        h = y.astype(jnp.bfloat16)
    o_ref[...] = y.astype(o_ref.dtype)


@functools.partial(jax.jit, static_argnames=("tb",))
def _style_mlp(x, w_stacked, b_stacked, *, tb):
    b_pad, dp = x.shape
    n_mlp = w_stacked.shape[0]

    # Explicit scoped-VMEM budget: resident weights/bias (x2 buffering margin),
    # double-buffered activation tiles in/out, plus headroom for in-kernel temporaries.
    est = (2 * n_mlp * dp * dp * 2            # weights (bf16)
           + 2 * n_mlp * 8 * dp * 2           # bias (bf16, sublane-padded)
           + 2 * tb * dp * 4                  # x tiles (double-buffered, f32)
           + 2 * tb * dp * 4                  # out tiles (double-buffered, f32)
           + 4 * tb * dp * 4)                 # temporaries (y, h)
    vmem_limit = int(min(max(est, 16 * 2**20), 48 * 2**20))

    return pl.pallas_call(
        _style_mlp_kernel,
        out_shape=jax.ShapeDtypeStruct((b_pad, dp), x.dtype),
        grid=(b_pad // tb,),
        in_specs=[
            pl.BlockSpec((tb, dp), lambda i: (i, 0)),             # activations (tiled on batch)
            pl.BlockSpec((n_mlp, dp, dp), lambda i: (0, 0, 0)),   # full weight stack, resident
            pl.BlockSpec((n_mlp, 1, dp), lambda i: (0, 0, 0)),    # full bias stack, resident
        ],
        out_specs=pl.BlockSpec((tb, dp), lambda i: (i, 0)),
        compiler_params=pltpu.CompilerParams(
            dimension_semantics=("parallel",),
            vmem_limit_bytes=vmem_limit,
        ),
    )(x, w_stacked, b_stacked)


class StyledGeneratorPallas:
    """JAX/Pallas port of the PyTorch StyledGenerator (inference semantics)."""

    def __init__(self, code_dim, n_mlp, drop, *, key):
        assert n_mlp >= 1
        self.code_dim = code_dim
        self.n_mlp = n_mlp
        self.drop = drop  # unused at inference (dropout is identity)
        self.dp = _round_up(code_dim, 128)  # lane-pad feature dim

        # Deterministic init mimicking nn.Linear's default (uniform +-1/sqrt(fan_in)).
        bound = 1.0 / sqrt(code_dim)
        ws, bs = [], []
        for _ in range(n_mlp):
            key, kw, kb = jax.random.split(key, 3)
            w = jax.random.uniform(kw, (code_dim, code_dim), jnp.float32, -bound, bound)
            b = jax.random.uniform(kb, (code_dim,), jnp.float32, -bound, bound)
            ws.append(w.T)  # store (in, out) so kernel computes h @ W_t == h @ W.T
            bs.append(b)

        # Unpadded bf16 copies for the pure-JAX reference.
        self.w_unpadded = jnp.stack(ws, axis=0).astype(jnp.bfloat16)             # (n_mlp, D, D)
        self.b_unpadded = jnp.stack(bs, axis=0).astype(jnp.bfloat16).reshape(
            n_mlp, 1, code_dim)                                                   # (n_mlp, 1, D)

        # Zero-padded bf16 stacks for the kernel (exact: padded rows/cols stay zero).
        pad = self.dp - code_dim
        self.w_stacked = jnp.pad(self.w_unpadded, ((0, 0), (0, pad), (0, pad)))   # (n_mlp, Dp, Dp)
        self.b_stacked = jnp.pad(self.b_unpadded, ((0, 0), (0, 0), (0, pad)))     # (n_mlp, 1, Dp)

    def __call__(self, x):
        if not isinstance(x, (list, tuple)):
            x = [x]
        sizes = [xi.shape[0] for xi in x]
        # One kernel launch for the whole list: weights are DMA'd into VMEM once.
        x_cat = jnp.concatenate(list(x), axis=0)
        b_total = x_cat.shape[0]

        # Batch tile: multiple of 8 sublanes, capped at 512; aim for >=2 tiles when the
        # batch is big enough so the "parallel" grid axis can use both TCs on v7x.
        b8 = _round_up(b_total, 8)
        if b8 >= 16:
            tb = min(512, _round_up((b8 + 1) // 2, 8))
        else:
            tb = b8
        b_pad = _round_up(b_total, tb)

        # Single pad (no zeros+scatter round trip); zero padding is exact through the MLP.
        x_pad = jnp.pad(x_cat, ((0, b_pad - b_total), (0, self.dp - self.code_dim)))

        out = _style_mlp(x_pad, self.w_stacked, self.b_stacked, tb=int(tb))
        out = out[:b_total, : self.code_dim]

        styles = []
        off = 0
        for s in sizes:
            styles.append(out[off:off + s])
            off += s
        return styles


def _reference_style_mlp(x, w_unpadded, b_unpadded):
    """Pure-JAX reference (same bf16-weight / f32-accumulate numerics as the kernel)."""
    h = x.astype(jnp.float32)
    for l in range(w_unpadded.shape[0]):
        y = jnp.dot(h.astype(jnp.bfloat16), w_unpadded[l],
                    preferred_element_type=jnp.float32)
        y = y + b_unpadded[l].astype(jnp.float32)
        y = jnp.where(y >= 0.0, y, 0.002 * y)
        h = y
    return h.astype(x.dtype)


if __name__ == "__main__":
    code_dim = 32
    n_mlp = 4
    drop = 0.1
    batch = 2

    key = jax.random.PRNGKey(0)
    key, k_model, k_x0, k_x1 = jax.random.split(key, 4)

    gen = StyledGeneratorPallas(code_dim, n_mlp, drop, key=k_model)

    # Exercise the list-input path of StyledGenerator.forward.
    x0 = jax.random.normal(k_x0, (batch, code_dim), jnp.float32)
    x1 = jax.random.normal(k_x1, (batch, code_dim), jnp.float32)

    styles = gen([x0, x1])
    styles = [jax.block_until_ready(s) for s in styles]

    # Correctness check against pure-JAX reference.
    ref0 = _reference_style_mlp(x0, gen.w_unpadded, gen.b_unpadded)
    ref1 = _reference_style_mlp(x1, gen.w_unpadded, gen.b_unpadded)
    assert styles[0].shape == (batch, code_dim)
    assert styles[1].shape == (batch, code_dim)
    assert jnp.allclose(styles[0], ref0, atol=1e-3, rtol=1e-3)
    assert jnp.allclose(styles[1], ref1, atol=1e-3, rtol=1e-3)

    print("KERNEL_OK")
</pallas_src>

<mosaic_0001>
module attributes {stable_mosaic.version = 11 : i64} {
  func.func @_style_mlp_kernel(%arg0: i32, %arg1: memref<8x128xf32, #tpu.memory_space<vmem>>, %arg2: memref<4x128x128xbf16, #tpu.memory_space<vmem>>, %arg3: memref<4x1x128xbf16, #tpu.memory_space<vmem>>, %arg4: memref<8x128xf32, #tpu.memory_space<vmem>>) attributes {dimension_semantics = [#tpu.dimension_semantics<parallel>], iteration_bounds = array<i64: 1>, scalar_prefetch = 0 : i64, scratch_operands = 0 : i64, tpu.core_type = #tpu.core_type<tc>, window_params = [{transform_indices = @transform_0, window_bounds = array<i64: 8, 128>}, {pipeline_mode = #tpu.pipeline_mode<synchronous>, transform_indices = @transform_1, window_bounds = array<i64: 4, 128, 128>}, {pipeline_mode = #tpu.pipeline_mode<synchronous>, transform_indices = @transform_2, window_bounds = array<i64: 4, 1, 128>}, {transform_indices = @transform_3, window_bounds = array<i64: 8, 128>}]} {
    %c0 = arith.constant 0 : index
    %c0_0 = arith.constant 0 : index
    %0 = vector.load %arg1[%c0, %c0_0] : memref<8x128xf32, #tpu.memory_space<vmem>>, vector<8x128xf32>
    %1 = arith.truncf %0 : vector<8x128xf32> to vector<8x128xbf16>
    %c0_1 = arith.constant 0 : index
    %c0_2 = arith.constant 0 : index
    %c0_3 = arith.constant 0 : index
    %2 = vector.load %arg2[%c0_1, %c0_2, %c0_3] : memref<4x128x128xbf16, #tpu.memory_space<vmem>>, vector<1x128x128xbf16>
    %3 = vector.shape_cast %2 : vector<1x128x128xbf16> to vector<128x128xbf16>
    %cst = arith.constant dense<0.000000e+00> : vector<8x128xf32>
    %4 = tpu.matmul %1, %3, %cst {dimension_numbers = #tpu.dot_dimension_numbers<[1], [0], [0], [1], [0, 0, 1, 1], [], []>} : vector<8x128xbf16>, vector<128x128xbf16>, vector<8x128xf32> -> vector<8x128xf32>
    %c0_4 = arith.constant 0 : index
    %c0_5 = arith.constant 0 : index
    %c0_6 = arith.constant 0 : index
    %5 = vector.load %arg3[%c0_4, %c0_5, %c0_6] : memref<4x1x128xbf16, #tpu.memory_space<vmem>>, vector<1x1x128xbf16>
    %6 = vector.shape_cast %5 : vector<1x1x128xbf16> to vector<1x128xbf16>
    %7 = arith.extf %6 : vector<1x128xbf16> to vector<1x128xf32>
    %8 = vector.broadcast %7 : vector<1x128xf32> to vector<8x128xf32>
    %9 = arith.addf %4, %8 : vector<8x128xf32>
    %cst_7 = arith.constant 0.000000e+00 : f32
    %10 = vector.broadcast %cst_7 : f32 to vector<8x128xf32>
    %11 = arith.cmpf oge, %9, %10 : vector<8x128xf32>
    %cst_8 = arith.constant 2.000000e-03 : f32
    %12 = vector.broadcast %cst_8 : f32 to vector<8x128xf32>
    %13 = arith.mulf %12, %9 : vector<8x128xf32>
    %14 = arith.select %11, %9, %13 : vector<8x128xi1>, vector<8x128xf32>
    %15 = arith.truncf %14 : vector<8x128xf32> to vector<8x128xbf16>
    %c1 = arith.constant 1 : index
    %c0_9 = arith.constant 0 : index
    %c0_10 = arith.constant 0 : index
    %16 = vector.load %arg2[%c1, %c0_9, %c0_10] : memref<4x128x128xbf16, #tpu.memory_space<vmem>>, vector<1x128x128xbf16>
    %17 = vector.shape_cast %16 : vector<1x128x128xbf16> to vector<128x128xbf16>
    %cst_11 = arith.constant dense<0.000000e+00> : vector<8x128xf32>
    %18 = tpu.matmul %15, %17, %cst_11 {dimension_numbers = #tpu.dot_dimension_numbers<[1], [0], [0], [1], [0, 0, 1, 1], [], []>} : vector<8x128xbf16>, vector<128x128xbf16>, vector<8x128xf32> -> vector<8x128xf32>
    %c1_12 = arith.constant 1 : index
    %c0_13 = arith.constant 0 : index
    %c0_14 = arith.constant 0 : index
    %19 = vector.load %arg3[%c1_12, %c0_13, %c0_14] : memref<4x1x128xbf16, #tpu.memory_space<vmem>>, vector<1x1x128xbf16>
    %20 = vector.shape_cast %19 : vector<1x1x128xbf16> to vector<1x128xbf16>
    %21 = arith.extf %20 : vector<1x128xbf16> to vector<1x128xf32>
    %22 = vector.broadcast %21 : vector<1x128xf32> to vector<8x128xf32>
    %23 = arith.addf %18, %22 : vector<8x128xf32>
    %cst_15 = arith.constant 0.000000e+00 : f32
    %24 = vector.broadcast %cst_15 : f32 to vector<8x128xf32>
    %25 = arith.cmpf oge, %23, %24 : vector<8x128xf32>
    %cst_16 = arith.constant 2.000000e-03 : f32
    %26 = vector.broadcast %cst_16 : f32 to vector<8x128xf32>
    %27 = arith.mulf %26, %23 : vector<8x128xf32>
    %28 = arith.select %25, %23, %27 : vector<8x128xi1>, vector<8x128xf32>
    %29 = arith.truncf %28 : vector<8x128xf32> to vector<8x128xbf16>
    %c2 = arith.constant 2 : index
    %c0_17 = arith.constant 0 : index
    %c0_18 = arith.constant 0 : index
    %30 = vector.load %arg2[%c2, %c0_17, %c0_18] : memref<4x128x128xbf16, #tpu.memory_space<vmem>>, vector<1x128x128xbf16>
    %31 = vector.shape_cast %30 : vector<1x128x128xbf16> to vector<128x128xbf16>
    %cst_19 = arith.constant dense<0.000000e+00> : vector<8x128xf32>
    %32 = tpu.matmul %29, %31, %cst_19 {dimension_numbers = #tpu.dot_dimension_numbers<[1], [0], [0], [1], [0, 0, 1, 1], [], []>} : vector<8x128xbf16>, vector<128x128xbf16>, vector<8x128xf32> -> vector<8x128xf32>
    %c2_20 = arith.constant 2 : index
    %c0_21 = arith.constant 0 : index
    %c0_22 = arith.constant 0 : index
    %33 = vector.load %arg3[%c2_20, %c0_21, %c0_22] : memref<4x1x128xbf16, #tpu.memory_space<vmem>>, vector<1x1x128xbf16>
    %34 = vector.shape_cast %33 : vector<1x1x128xbf16> to vector<1x128xbf16>
    %35 = arith.extf %34 : vector<1x128xbf16> to vector<1x128xf32>
    %36 = vector.broadcast %35 : vector<1x128xf32> to vector<8x128xf32>
    %37 = arith.addf %32, %36 : vector<8x128xf32>
    %cst_23 = arith.constant 0.000000e+00 : f32
    %38 = vector.broadcast %cst_23 : f32 to vector<8x128xf32>
    %39 = arith.cmpf oge, %37, %38 : vector<8x128xf32>
    %cst_24 = arith.constant 2.000000e-03 : f32
    %40 = vector.broadcast %cst_24 : f32 to vector<8x128xf32>
    %41 = arith.mulf %40, %37 : vector<8x128xf32>
    %42 = arith.select %39, %37, %41 : vector<8x128xi1>, vector<8x128xf32>
    %43 = arith.truncf %42 : vector<8x128xf32> to vector<8x128xbf16>
    %c3 = arith.constant 3 : index
    %c0_25 = arith.constant 0 : index
    %c0_26 = arith.constant 0 : index
    %44 = vector.load %arg2[%c3, %c0_25, %c0_26] : memref<4x128x128xbf16, #tpu.memory_space<vmem>>, vector<1x128x128xbf16>
    %45 = vector.shape_cast %44 : vector<1x128x128xbf16> to vector<128x128xbf16>
    %cst_27 = arith.constant dense<0.000000e+00> : vector<8x128xf32>
    %46 = tpu.matmul %43, %45, %cst_27 {dimension_numbers = #tpu.dot_dimension_numbers<[1], [0], [0], [1], [0, 0, 1, 1], [], []>} : vector<8x128xbf16>, vector<128x128xbf16>, vector<8x128xf32> -> vector<8x128xf32>
    %c3_28 = arith.constant 3 : index
    %c0_29 = arith.constant 0 : index
    %c0_30 = arith.constant 0 : index
    %47 = vector.load %arg3[%c3_28, %c0_29, %c0_30] : memref<4x1x128xbf16, #tpu.memory_space<vmem>>, vector<1x1x128xbf16>
    %48 = vector.shape_cast %47 : vector<1x1x128xbf16> to vector<1x128xbf16>
    %49 = arith.extf %48 : vector<1x128xbf16> to vector<1x128xf32>
    %50 = vector.broadcast %49 : vector<1x128xf32> to vector<8x128xf32>
    %51 = arith.addf %46, %50 : vector<8x128xf32>
    %cst_31 = arith.constant 0.000000e+00 : f32
    %52 = vector.broadcast %cst_31 : f32 to vector<8x128xf32>
    %53 = arith.cmpf oge, %51, %52 : vector<8x128xf32>
    %cst_32 = arith.constant 2.000000e-03 : f32
    %54 = vector.broadcast %cst_32 : f32 to vector<8x128xf32>
    %55 = arith.mulf %54, %51 : vector<8x128xf32>
    %56 = arith.select %53, %51, %55 : vector<8x128xi1>, vector<8x128xf32>
    %c0_33 = arith.constant 0 : index
    %c0_34 = arith.constant 0 : index
    %57 = vector.load %arg4[%c0_33, %c0_34] : memref<8x128xf32, #tpu.memory_space<vmem>>, vector<8x128xf32>
    tpu.vector_store %arg4[%c0_33, %c0_34], %56 {strides = array<i32>} : memref<8x128xf32, #tpu.memory_space<vmem>>, vector<8x128xf32>,
    return
  }
  func.func @transform_0(%arg0: i32) -> (i32, i32) {
    %c0_i32 = arith.constant 0 : i32
    %c0_i32_0 = arith.constant 0 : i32
    return %arg0, %c0_i32 : i32, i32
  }
  func.func @transform_1(%arg0: i32) -> (i32, i32, i32) {
    %c0_i32 = arith.constant 0 : i32
    %c0_i32_0 = arith.constant 0 : i32
    %c0_i32_1 = arith.constant 0 : i32
    %c0_i32_2 = arith.constant 0 : i32
    return %c0_i32, %c0_i32_0, %c0_i32_1 : i32, i32, i32
  }
  func.func @transform_2(%arg0: i32) -> (i32, i32, i32) {
    %c0_i32 = arith.constant 0 : i32
    %c0_i32_0 = arith.constant 0 : i32
    %c0_i32_1 = arith.constant 0 : i32
    %c0_i32_2 = arith.constant 0 : i32
    return %c0_i32, %c0_i32_0, %c0_i32_1 : i32, i32, i32
  }
  func.func @transform_3(%arg0: i32) -> (i32, i32) {
    %c0_i32 = arith.constant 0 : i32
    %c0_i32_0 = arith.constant 0 : i32
    return %arg0, %c0_i32 : i32, i32
  }
}

</mosaic_0001>

<bundles_post_ra>
// kernel: _style_mlp.1
= control target key start
LH: loop header
LB: loop body
LE: loop exit
PB: predicated region body
PF: predicated region fallthrough
CT: control target
= control target key end

     0   :  { %8 = vsyncpa [#allocation3], 0  ;;  %s912_s0 = inlined_call_operand.hbm [shape: f32[8,128], index: 0, kind: input, shape index: {}]   ;;  %s913_s1 = inlined_call_operand.hbm [shape: bf16[4,128,128], index: 1, kind: input, shape index: {}]   ;;  %s914_s2 = inlined_call_operand.vmem [shape: bf16[4,1,128], index: 2, kind: input, shape index: {}]   ;;  %s915_s3 = inlined_call_operand.hbm [shape: f32[8,128], index: 3, kind: output, shape index: {}]  }
   0x1   :  { %9 = vsyncpa [#allocation6], 0 }
   0x2   :  { %10 = vsyncpa [#allocation4], 0  ;;  %s784_s12 = smov [#allocation2]   ;;  %s785_s14 = smov [#allocation5]  }
   0x3   :  { %s17_s13 = sshll.u32 %s784_s12, 4  ;;  %s26_s15 = sshll.u32 %s785_s14, 4  ;;  %s18_s13 = int_to_ptr.vmem [resolvable:$true] %s17_s13  ;;  %s811_s15 = int_to_ptr.vmem [resolvable:$true] %s26_s15 }
   0x4   :  { %s712_s18 = scalar_lea.hbm %s912_s0, 128 }
   0x5   :  { %p713_p0 = scmp.ne.s32.totalorder %s912_s0, %s712_s18  ;;  %p716_p1 = scmp.lt.u32.totalorder %s712_s18, %s912_s0 }
   0x7   :  { %p718_p2 = pnand %p716_p1, %p713_p0 }
   0x9   :  { %721 = shalt.err (!%p718_p2)
}
   0xa   :  { %s722_s23 = scalar_lea.vmem %s18_s13, 128  ;;  %p727_p4 = scmp.lt.s32.totalorder %s18_s13, %s18_s13 }
   0xb   :  { %p723_p3 = scmp.ne.s32.totalorder %s18_s13, %s722_s23  ;;  %p728_p5 = scmp.lt.s32.totalorder %s722_s23, %s722_s23 }
   0xd   :  { %p729_p6 = por %p728_p5, %p727_p4 }
   0xf   :  { %p730_p7 = pnand %p729_p6, %p723_p3 }
  0x11   :  { %733 = shalt.err (!%p730_p7)
}
  0x12   :  { %20 = dma.hbm_to_vmem [thread:$0]  %s912_s0, 128, %s18_s13, [#allocation3]  }
  0x13   :  { %s734_s28 = scalar_lea.hbm %s913_s1, 4096 }
  0x14   :  { %p735_p8 = scmp.ne.s32.totalorder %s913_s1, %s734_s28  ;;  %p738_p9 = scmp.lt.u32.totalorder %s734_s28, %s913_s1 }
  0x16   :  { %p740_p10 = pnand %p738_p9, %p735_p8 }
  0x18   :  { %743 = shalt.err (!%p740_p10)
}
  0x19   :  { %s744_s6 = scalar_lea.vmem %s811_s15, 4096  ;;  %p749_p12 = scmp.lt.s32.totalorder %s811_s15, %s811_s15 }
  0x1a   :  { %p745_p11 = scmp.ne.s32.totalorder %s811_s15, %s744_s6  ;;  %p750_p13 = scmp.lt.s32.totalorder %s744_s6, %s744_s6 }
  0x1c   :  { %p751_p0 = por %p750_p13, %p749_p12 }
  0x1e   :  { %p752_p1 = pnand %p751_p0, %p745_p11 }
  0x20   :  { %755 = shalt.err (!%p752_p1)
}
  0x21   :  { %s786_s0 = smov 64   ;;  %s787_s7 = smov 4  }
  0x22   :  { %32 = dma.hbm_to_vmem [thread:$0]  %s913_s1, 4096, %s811_s15, [#allocation6], %s786_s0, %s786_s0, %s787_s7  }
  0x23   :  { %778 = dma.done.wait [#allocation3], 128  }
  0x24   :  { %779 = vsyncadd [#allocation3], 4294967168 }
  0x25   :  { %780 = dma.done.wait [#allocation6], 4096  }
  0x26   :  { %781 = vsyncadd [#allocation6], 4294963200  ;;  %v788_v0 = vmov 0.0   ;;  %vm789_vm0 = vmmov 0   ;;  %v680_v1 = vld [vmem:[#allocation5] sm:$0xff]   ;;  %v681_v2 = vld [vmem:[#allocation5 + $0x8] sm:$0xff]   ;;  %v62_v25 = vlaneseq }
  0x27   :  { %593 = vmatprep.subr.bf16.mxu0 %v788_v0  ;;  %609 = vmatprep.mubr.msk.bf16.mxu0 %vm789_vm0, %v788_v0  ;;  %v682_v3 = vld [vmem:[#allocation5 + $0x10] sm:$0xff]   ;;  %v688_v4 = vld [vmem:[#allocation5 + $0x40] sm:$0xff]   ;;  %v683_v5 = vld [vmem:[#allocation5 + $0x18] sm:$0xff]   ;;  %s790_s17 = smov [#allocation7]  }
  0x28   :  { %613 = vmatprep.subr.bf16.mxu1 %v788_v0  ;;  %629 = vmatprep.mubr.msk.bf16.mxu1 %vm789_vm0, %v788_v0  ;;  %v689_v6 = vld [vmem:[#allocation5 + $0x48] sm:$0xff]   ;;  %v684_v7 = vld [vmem:[#allocation5 + $0x20] sm:$0xff]   ;;  %v690_v8 = vld [vmem:[#allocation5 + $0x50] sm:$0xff]   ;;  %v63_v26 = vshrl.u32 %v62_v25, 7  ;;  %s512_s18 = sshll.u32 %s790_s17, 4  ;;  %s513_s18 = int_to_ptr.vmem [resolvable:$true] %s512_s18 }
  0x29   :  { %594 = vmatpush3.bf16.msra.mxu0 %v680_v1  ;;  %614 = vmatpush3.bf16.msra.mxu1 %v688_v4  ;;  %v685_v9 = vld [vmem:[#allocation5 + $0x28] sm:$0xff]   ;;  %v691_v10 = vld [vmem:[#allocation5 + $0x58] sm:$0xff]   ;;  %v686_v11 = vld [vmem:[#allocation5 + $0x30] sm:$0xff]   ;;  %s756_s19 = scalar_lea.vmem %s513_s18, 128  ;;  %p761_p3 = scmp.lt.s32.totalorder %s513_s18, %s513_s18 }
  0x2a   :  { %595 = vmatprep.subr.bf16.mxu0 %v788_v0  ;;  %615 = vmatprep.subr.bf16.mxu1 %v788_v0  ;;  %v692_v12 = vld [vmem:[#allocation5 + $0x60] sm:$0xff]   ;;  %v687_v13 = vld [vmem:[#allocation5 + $0x38] sm:$0xff]   ;;  %v693_v15 = vld [vmem:[#allocation5 + $0x68] sm:$0xff]   ;;  %v875_v29 = vsub.s32 0, %v63_v26  ;;  %p757_p2 = scmp.ne.s32.totalorder %s513_s18, %s756_s19  ;;  %p762_p4 = scmp.lt.s32.totalorder %s756_s19, %s756_s19 }
  0x2b   :  { %v42_v14 = vld [vmem:[#allocation2] sm:$0xff]  ;;  %v694_v17 = vld [vmem:[#allocation5 + $0x70] sm:$0xff]   ;;  %v696_v19 = vld [vmem:[#allocation5 + $0x80] sm:$0xff]  }
  0x2c   :  { %v43_v16 = vpack.c.bf16 %v42_v14, %v42_v14  ;;  %v695_v18 = vld [vmem:[#allocation5 + $0x78] sm:$0xff]   ;;  %v697_v20 = vld [vmem:[#allocation5 + $0x88] sm:$0xff]   ;;  %v698_v21 = vld [vmem:[#allocation5 + $0x90] sm:$0xff]   ;;  %p763_p5 = por %p762_p4, %p761_p3 }
  0x2d   :  { %596 = vmatpush3.bf16.msra.mxu0 %v681_v2  ;;  %616 = vmatpush3.bf16.msra.mxu1 %v689_v6  ;;  %v699_v22 = vld [vmem:[#allocation5 + $0x98] sm:$0xff]   ;;  %v700_v23 = vld [vmem:[#allocation5 + $0xa0] sm:$0xff]   ;;  %v701_v24 = vld [vmem:[#allocation5 + $0xa8] sm:$0xff]  }
  0x2e   :  { %597 = vmatprep.subr.bf16.mxu0 %v788_v0  ;;  %617 = vmatprep.subr.bf16.mxu1 %v788_v0  ;;  %v60_v27 = vld [vmem:[%s914_s2] sm:$0x1]  ;;  %v702_v39 = vld [vmem:[#allocation5 + $0xb0] sm:$0xff]   ;;  %v704_v41 = vld [vmem:[#allocation5 + $0xc0] sm:$0xff]   ;;  %p764_p6 = pnand %p763_p5, %p757_p2 }
  0x2f   :  { %v61_v28 = vunpack.c.l.bf16 %v60_v27  ;;  %v703_v40 = vld [vmem:[#allocation5 + $0xb8] sm:$0xff]   ;;  %v705_v42 = vld [vmem:[#allocation5 + $0xc8] sm:$0xff]   ;;  %v706_v43 = vld [vmem:[#allocation5 + $0xd0] sm:$0xff]  }
  0x30   :  { %v707_v44 = vld [vmem:[#allocation5 + $0xd8] sm:$0xff]   ;;  %v708_v45 = vld [vmem:[#allocation5 + $0xe0] sm:$0xff]   ;;  %v709_v46 = vld [vmem:[#allocation5 + $0xe8] sm:$0xff]  }
  0x31   :  { %598 = vmatpush3.bf16.msra.mxu0 %v682_v3  ;;  %618 = vmatpush3.bf16.msra.mxu1 %v690_v8  ;;  %v65_v30 = vrot.slane %v61_v28, %v875_v29  ;;  %v530_v47 = vld [vmem:[%s914_s2 + $0x1] sm:$0x1]  ;;  %v710_v58 = vld [vmem:[#allocation5 + $0xf0] sm:$0xff]   ;;  %v539_v60 = vld [vmem:[%s914_s2 + $0x2] sm:$0x1] }
  0x32   :  { %599 = vmatprep.subr.bf16.mxu0 %v788_v0  ;;  %619 = vmatprep.subr.bf16.mxu1 %v788_v0  ;;  %v177_v48 = vunpack.c.l.bf16 %v530_v47  ;;  %v711_v59 = vld [vmem:[#allocation5 + $0xf8] sm:$0xff]   ;;  %v293_v61 = vunpack.c.l.bf16 %v539_v60 }
  0x34   :  { %v181_v49 = vrot.slane %v177_v48, %v875_v29  ;;  %v297_v62 = vrot.slane %v293_v61, %v875_v29 }
  0x35   :  { %600 = vmatpush3.bf16.msra.mxu0 %v683_v5  ;;  %620 = vmatpush3.bf16.msra.mxu1 %v691_v10 }
  0x36   :  { %601 = vmatprep.subr.bf16.mxu0 %v788_v0  ;;  %621 = vmatprep.subr.bf16.mxu1 %v788_v0 }
  0x39   :  { %602 = vmatpush3.bf16.msra.mxu0 %v684_v7  ;;  %622 = vmatpush3.bf16.msra.mxu1 %v692_v12 }
  0x3a   :  { %603 = vmatprep.subr.bf16.mxu0 %v788_v0  ;;  %623 = vmatprep.subr.bf16.mxu1 %v788_v0 }
  0x3d   :  { %604 = vmatpush3.bf16.msra.mxu0 %v685_v9  ;;  %624 = vmatpush3.bf16.msra.mxu1 %v693_v15 }
  0x3e   :  { %605 = vmatprep.subr.bf16.mxu0 %v788_v0  ;;  %625 = vmatprep.subr.bf16.mxu1 %v788_v0 }
  0x41   :  { %606 = vmatpush3.bf16.msra.mxu0 %v686_v11  ;;  %626 = vmatpush3.bf16.msra.mxu1 %v694_v17 }
  0x42   :  { %607 = vmatprep.subr.bf16.mxu0 %v788_v0  ;;  %627 = vmatprep.subr.bf16.mxu1 %v788_v0 }
  0x45   :  { %608 = vmatpush3.bf16.msra.mxu0 %v687_v13  ;;  %628 = vmatpush3.bf16.msra.mxu1 %v695_v18 }
  0x46   :  { %633 = vmatprep.subr.bf16.mxu0 %v788_v0  ;;  %653 = vmatprep.subr.bf16.mxu1 %v788_v0 }
  0x48   :  { %610 = vmatmul.mubr.bf16.vlgmr.msra.gmra.mrb[0].mxu0 %v43_v16 }
  0x49   :  { %649 = vmatprep.mubr.msk.bf16.mxu0 %vm789_vm0, %v788_v0  ;;  %634 = vmatpush3.bf16.msra.mxu0 %v696_v19 }
  0x4a   :  { %635 = vmatprep.subr.bf16.mxu0 %v788_v0 }
  0x4d   :  { %636 = vmatpush3.bf16.msra.mxu0 %v697_v20 }
  0x4e   :  { %637 = vmatprep.subr.bf16.mxu0 %v788_v0 }
  0x51   :  { %638 = vmatpush3.bf16.msra.mxu0 %v698_v21 }
  0x52   :  { %639 = vmatprep.subr.bf16.mxu0 %v788_v0 }
  0x55   :  { %640 = vmatpush3.bf16.msra.mxu0 %v699_v22 }
  0x56   :  { %641 = vmatprep.subr.bf16.mxu0 %v788_v0 }
  0x59   :  { %642 = vmatpush3.bf16.msra.mxu0 %v700_v23 }
  0x5a   :  { %643 = vmatprep.subr.bf16.mxu0 %v788_v0 }
  0x5d   :  { %644 = vmatpush3.bf16.msra.mxu0 %v701_v24 }
  0x5e   :  { %645 = vmatprep.subr.bf16.mxu0 %v788_v0 }
  0x61   :  { %646 = vmatpush3.bf16.msra.mxu0 %v702_v39 }
  0x62   :  { %647 = vmatprep.subr.bf16.mxu0 %v788_v0 }
  0x65   :  { %648 = vmatpush3.bf16.msra.mxu0 %v703_v40 }
 0x11b   :  { %v148_v31 = vpop.f32.mrb[0].mxu0 }
 0x11c   :  { %v149_v32 = vadd.f32 %v148_v31, %v65_v30  ;;  %v611_v33 = vpop.f32.mrb[1].mxu0 }
 0x11d   :  { %v151_v34 = vpop.f32.mrb[2].mxu0 }
 0x11e   :  { %vm154_vm1 = vcmp.ge.f32.partialorder %v149_v32, 0.0  ;;  %v155_v35 = vmul.f32 0.002, %v149_v32  ;;  %v612_v36 = vpop.f32.mrb[3].mxu0 }
 0x120   :  { %v156_v37 = vsel %vm154_vm1, %v149_v32, %v155_v35 }
 0x121   :  { %v157_v38 = vpack.c.bf16 %v156_v37, %v156_v37 }
 0x123   :  { %630 = vmatmul.mubr.bf16.vlgmr.msra.gmra.mrb[0].mxu1 %v157_v38 }
 0x124   :  { %669 = vmatprep.mubr.msk.bf16.mxu1 %vm789_vm0, %v788_v0  ;;  %654 = vmatpush3.bf16.msra.mxu1 %v704_v41 }
 0x125   :  { %655 = vmatprep.subr.bf16.mxu1 %v788_v0 }
 0x128   :  { %656 = vmatpush3.bf16.msra.mxu1 %v705_v42 }
 0x129   :  { %657 = vmatprep.subr.bf16.mxu1 %v788_v0 }
 0x12c   :  { %658 = vmatpush3.bf16.msra.mxu1 %v706_v43 }
 0x12d   :  { %659 = vmatprep.subr.bf16.mxu1 %v788_v0 }
 0x130   :  { %660 = vmatpush3.bf16.msra.mxu1 %v707_v44 }
 0x131   :  { %661 = vmatprep.subr.bf16.mxu1 %v788_v0 }
 0x134   :  { %662 = vmatpush3.bf16.msra.mxu1 %v708_v45 }
 0x135   :  { %663 = vmatprep.subr.bf16.mxu1 %v788_v0 }
 0x138   :  { %664 = vmatpush3.bf16.msra.mxu1 %v709_v46 }
 0x139   :  { %665 = vmatprep.subr.bf16.mxu1 %v788_v0 }
 0x13c   :  { %666 = vmatpush3.bf16.msra.mxu1 %v710_v58 }
 0x13d   :  { %667 = vmatprep.subr.bf16.mxu1 %v788_v0  ;;  %v548_v0 = vld [vmem:[%s914_s2 + $0x3] sm:$0x1] }
 0x13e   :  { %v409_v8 = vunpack.c.l.bf16 %v548_v0 }
 0x140   :  { %668 = vmatpush3.bf16.msra.mxu1 %v711_v59  ;;  %v413_v9 = vrot.slane %v409_v8, %v875_v29 }
 0x1f6   :  { %v264_v50 = vpop.f32.mrb[0].mxu1 }
 0x1f7   :  { %v265_v51 = vadd.f32 %v264_v50, %v181_v49  ;;  %v631_v52 = vpop.f32.mrb[1].mxu1 }
 0x1f8   :  { %v267_v53 = vpop.f32.mrb[2].mxu1 }
 0x1f9   :  { %vm270_vm2 = vcmp.ge.f32.partialorder %v265_v51, 0.0  ;;  %v271_v54 = vmul.f32 0.002, %v265_v51  ;;  %v632_v55 = vpop.f32.mrb[3].mxu1 }
 0x1fb   :  { %v272_v56 = vsel %vm270_vm2, %v265_v51, %v271_v54 }
 0x1fc   :  { %v273_v57 = vpack.c.bf16 %v272_v56, %v272_v56 }
 0x1fe   :  { %650 = vmatmul.mubr.bf16.vlgmr.msra.gmra.mrb[4].mxu0 %v273_v57 }
 0x2d1   :  { %v380_v63 = vpop.f32.mrb[4].mxu0 }
 0x2d2   :  { %v381_v1 = vadd.f32 %v380_v63, %v297_v62  ;;  %v651_v2 = vpop.f32.mrb[5].mxu0 }
 0x2d3   :  { %v383_v3 = vpop.f32.mrb[6].mxu0 }
 0x2d4   :  { %vm386_vm3 = vcmp.ge.f32.partialorder %v381_v1, 0.0  ;;  %v387_v4 = vmul.f32 0.002, %v381_v1  ;;  %v652_v5 = vpop.f32.mrb[7].mxu0 }
 0x2d6   :  { %v388_v6 = vsel %vm386_vm3, %v381_v1, %v387_v4 }
 0x2d7   :  { %v389_v7 = vpack.c.bf16 %v388_v6, %v388_v6 }
 0x2d9   :  { %670 = vmatmul.mubr.bf16.vlgmr.msra.gmra.mrb[4].mxu1 %v389_v7 }
 0x3ac   :  { %v496_v10 = vpop.f32.mrb[4].mxu1 }
 0x3ad   :  { %v497_v11 = vadd.f32 %v496_v10, %v413_v9  ;;  %v671_v12 = vpop.f32.mrb[5].mxu1 }
 0x3ae   :  { %v499_v13 = vpop.f32.mrb[6].mxu1 }
 0x3af   :  { %v503_v14 = vmul.f32 0.002, %v497_v11  ;;  %v672_v15 = vpop.f32.mrb[7].mxu1  ;;  %vm502_vm4 = vcmp.ge.f32.partialorder %v497_v11, 0.0 }
 0x3b1   :  { %v504_v16 = vsel %vm502_vm4, %v497_v11, %v503_v14 }
 0x3b2   :  { %505 = vst [vmem:[#allocation7] sm:$0xff] %v504_v16 }
 0x3b3   :  { %767 = shalt.err (!%p764_p6)
}
 0x3b4   :  { %s768_s21 = scalar_lea.hbm %s915_s3, 128 }
 0x3b5   :  { %p769_p7 = scmp.ne.s32.totalorder %s915_s3, %s768_s21  ;;  %p772_p8 = scmp.lt.u32.totalorder %s768_s21, %s915_s3 }
 0x3b7   :  { %p774_p9 = pnand %p772_p8, %p769_p7 }
 0x3b9   :  { %777 = shalt.err (!%p774_p9)
}
 0x3ba   :  { %515 = dma.vmem_to_hbm [thread:$0]  %s513_s18, 128, %s915_s3, [#allocation4]  }
 0x3bb   :  { %782 = dma.done.wait [#allocation4], 128  }
 0x3bc   :  { %783 = vsyncadd [#allocation4], 4294967168 }
 0x3bd   :  { %519 = vsyncpa [#allocation3], 1 }
 0x3be   :  { %520 = vsyncpa [#allocation6], 1 }
 0x3bf   :  { %521 = vsyncpa [#allocation4], 1 }

</bundles_post_ra>
